<compile_context>
chip_gen: v7x
topology: tpu7x:2x2x1
jax: 0.10.0
libtpu: 0.0.40
codegen_flags: <defaults>
</compile_context>

<pallas_src>
import functools

import jax
import jax.numpy as jnp
from jax import lax
from jax.experimental import pallas as pl
from jax.experimental.pallas import tpu as pltpu


def _suploss_kernel(featq_ref, featkt_ref, labq_ref, labk_ref, npos_ref,
                    mlp_ref, *, inv_temperature):
    # Query tile: one f32 -> bf16 rounding, with 1/T folded in (O(tq*D) work
    # instead of scaling the [tq, B] sim matrix).
    fq_raw = featq_ref[...]                                    # [tq, D] f32
    fq32 = fq_raw * inv_temperature
    fq = fq32.astype(jnp.bfloat16)                             # [tq, D] bf16
    fkt = featkt_ref[...]                                      # [D, B] bf16, resident

    # bf16 x bf16 -> f32 accumulate on the MXU: sim = (f/T) @ f.T
    sim = lax.dot_general(
        fq, fkt, (((1,), (0,)), ((), ())), preferred_element_type=jnp.float32
    )                                                          # [tq, B]

    same = labq_ref[...] == labk_ref[...]                      # [tq, B] bool

    # Row-max shift: every term (including the exp(0)=1 fills of the PyTorch
    # reference) picks up a common exp(-m) factor that cancels exactly in
    # log(pos_sum / neg_sum), so semantics are unchanged but exp stays finite.
    m = jnp.max(sim, axis=1, keepdims=True)                    # [tq, 1]
    e = jnp.exp(sim - m)                                       # [tq, B] single EUP pass
    fill = jnp.exp(-m)                                         # [tq, 1] == exp(0 - m)

    # Analytic diagonal (self-similarity) term, computed from the same
    # bf16-rounded operands the MXU saw so it tracks sim's diagonal exactly.
    # Replaces the two [tq, B] iotas + compare + AND + select of the old mask.
    fk_self = fq_raw.astype(jnp.bfloat16).astype(jnp.float32)  # [tq, D]
    sim_ii = jnp.sum(fq.astype(jnp.float32) * fk_self, axis=1, keepdims=True)
    e_ii = jnp.exp(sim_ii - m)                                 # [tq, 1]

    # Masked-out entries contribute exp(0 - m) = fill, reproducing the
    # reference's "zero before exp" semantics after the shift.
    # (A further rearrangement pos = sum(e) + B*fill - neg - e_ii + fill would
    #  drop one more select but risks cancellation for sparse positives; not
    #  applied.)
    pos_sum = (jnp.sum(jnp.where(same, e, fill), axis=1, keepdims=True)
               - e_ii + fill)                                  # [tq, 1]
    neg_sum = jnp.sum(jnp.where(same, fill, e), axis=1, keepdims=True)

    log_prob = jnp.log(pos_sum / neg_sum)                      # [tq, 1]

    # Lane-dense store: a single small sublane->lane relayout of tq values,
    # then one unmasked row write.
    tq = log_prob.shape[0]
    mlp_ref[...] = log_prob.reshape(1, tq) / npos_ref[...]     # [1, tq]


def _pick_block_rows(batch):
    # Prefer large, MXU-shaped row tiles (bf16 sublane packing stays full and
    # the ~0.35us/step pipeline overhead is amortized) while keeping >= 2 grid
    # steps so the "parallel" row axis can split across TensorCores (v7x).
    for t in (512, 256, 128, 64):
        if batch % t == 0 and batch // t >= 2:
            return t
    return batch  # small / awkward batch: single full-height tile


def sup_loss(features, labels, temperature=0.5, block_rows=None):
    """features: [B, D] float, labels: [B] int.  Returns (loss, mean_log_prob [B,1])."""
    B, D = features.shape
    if labels.shape[0] != B:
        raise ValueError("Num of labels does not match num of features")

    if (block_rows is not None and B % block_rows == 0
            and (block_rows == B or block_rows % 8 == 0)):
        tq = block_rows                      # explicit override (>=64 recommended)
    else:
        tq = _pick_block_rows(B)
    num_tiles = B // tq

    # Queries stay f32 (rounded to bf16 exactly once, in-kernel); keys are cast
    # once and pre-transposed (layout plumbing, not compute).
    feat_f32 = features.astype(jnp.float32)                     # [B, D]
    fkt = features.astype(jnp.bfloat16).T                       # [D, B]
    labels_i32 = labels.astype(jnp.int32)
    lab_col = labels_i32.reshape(B, 1)
    lab_row = labels_i32.reshape(1, B)
    # Precompute n_pos = (#same-label partners) once, outside the kernel.
    n_pos = (jnp.sum(lab_col == lab_row, axis=1).astype(jnp.float32) - 1.0
             ).reshape(num_tiles, 1, tq)                        # lane-dense per tile
    # NOTE: rows with no same-label partner give n_pos == 0 -> inf/NaN, exactly
    # as in the PyTorch reference.

    # Derive the VMEM limit from hardware + actual footprint instead of a
    # hard-coded 32 MiB (raise on 128 MiB chips, stay under the 64 MiB/TC v7x).
    try:
        phys_vmem = int(pltpu.get_tpu_info().vmem_capacity_bytes)
    except Exception:
        phys_vmem = 64 * 1024 * 1024
    footprint = (2 * tq * D * 4                 # double-buffered f32 query tiles
                 + 2 * D * B * 2                # resident bf16 key (double-buffered)
                 + 2 * (tq * 4 + B * 4 + tq * 4 + tq * 4)   # labels / n_pos / out
                 + 6 * tq * B * 4)              # sim / exp / select temporaries
    vmem_limit = min(max(32 * 1024 * 1024, footprint + 8 * 1024 * 1024),
                     phys_vmem * 3 // 4)

    kernel = functools.partial(
        _suploss_kernel, inv_temperature=float(1.0 / temperature))

    out = pl.pallas_call(
        kernel,
        out_shape=jax.ShapeDtypeStruct((num_tiles, 1, tq), jnp.float32),
        grid_spec=pltpu.PrefetchScalarGridSpec(
            num_scalar_prefetch=0,
            grid=(num_tiles,),
            in_specs=[
                pl.BlockSpec((tq, D), lambda i: (i, 0)),           # f32 query rows
                pl.BlockSpec((D, B), lambda i: (0, 0)),            # resident bf16 keys
                pl.BlockSpec((tq, 1), lambda i: (i, 0)),           # query labels (col)
                pl.BlockSpec((1, B), lambda i: (0, 0)),            # key labels (row)
                pl.BlockSpec((None, 1, tq), lambda i: (i, 0, 0)),  # n_pos (lane-dense)
            ],
            out_specs=pl.BlockSpec((None, 1, tq), lambda i: (i, 0, 0)),
        ),
        compiler_params=pltpu.CompilerParams(
            dimension_semantics=("parallel",),
            vmem_limit_bytes=int(vmem_limit),
        ),
        cost_estimate=pl.CostEstimate(
            flops=2 * B * B * D,
            transcendentals=B * B + 2 * B,
            bytes_accessed=B * D * 4 + B * D * 2 + 2 * B * 4 + B * 4 + B * 4,
        ),
    )(feat_f32, fkt, lab_col, lab_row, n_pos)

    mlp = out.reshape(B, 1)
    # Final scalar: mean over B tiny values — done outside the kernel so the
    # row grid axis stays parallel (no cross-tile accumulator needed).
    loss = -jnp.mean(mlp)
    return loss, mlp


def _reference(features, labels, temperature=0.5):
    # pure-JAX f32 reference mirroring the PyTorch forward
    B = features.shape[0]
    lab = labels.reshape(-1, 1)
    mask = (lab == lab.T).astype(jnp.float32)
    sim = (features @ features.T) / temperature
    not_eye = 1.0 - jnp.eye(B, dtype=jnp.float32)
    sim_pos = sim * mask * not_eye
    sim_neg = sim * (1.0 - mask)
    log_prob = jnp.log(jnp.exp(sim_pos).sum(1, keepdims=True) /
                       jnp.exp(sim_neg).sum(1, keepdims=True))
    mean_log_prob = log_prob / (mask.sum(1, keepdims=True) - 1.0)
    loss = jnp.mean(-mean_log_prob)
    return loss, mean_log_prob


if __name__ == "__main__":
    key = jax.random.PRNGKey(0)
    B, D = 32, 128  # docstring: features [bsz, 128]
    feat = jax.random.normal(key, (B, D), dtype=jnp.float32)
    # typical contrastive setup: L2-normalized features
    feat = feat / jnp.linalg.norm(feat, axis=1, keepdims=True)
    # 4 classes, 8 positives each -> every sample has partners (denom != 0)
    labels = jnp.arange(B, dtype=jnp.int32) % 4

    # multi-tile path (4 grid steps) — exercises tiled query rows + lane-dense out
    loss_t, mlp_t = sup_loss(feat, labels, temperature=0.5, block_rows=8)
    # auto tile size (single full-height tile at this small B)
    loss_a, mlp_a = sup_loss(feat, labels, temperature=0.5)
    jax.block_until_ready((loss_t, mlp_t, loss_a, mlp_a))

    ref_loss, ref_mlp = _reference(feat, labels, temperature=0.5)
    # bf16 matmul inputs with f32 accumulation -> widened tolerances
    assert jnp.allclose(loss_t, ref_loss, rtol=2e-2, atol=2e-2)
    assert jnp.allclose(mlp_t, ref_mlp, rtol=2e-2, atol=2e-2)
    assert jnp.allclose(loss_a, ref_loss, rtol=2e-2, atol=2e-2)
    assert jnp.allclose(mlp_a, ref_mlp, rtol=2e-2, atol=2e-2)

    print("KERNEL_OK")
</pallas_src>

<mosaic_0001>
module attributes {stable_mosaic.version = 11 : i64} {
  func.func @_suploss_kernel(%arg0: i32, %arg1: memref<8x128xf32, #tpu.memory_space<vmem>>, %arg2: memref<128x32xbf16, #tpu.memory_space<vmem>>, %arg3: memref<8x1xi32, #tpu.memory_space<vmem>>, %arg4: memref<1x32xi32, #tpu.memory_space<vmem>>, %arg5: memref<1x1x8xf32, #tpu.memory_space<vmem>>, %arg6: memref<1x1x8xf32, #tpu.memory_space<vmem>>) attributes {dimension_semantics = [#tpu.dimension_semantics<parallel>], iteration_bounds = array<i64: 4>, scalar_prefetch = 0 : i64, scratch_operands = 0 : i64, tpu.core_type = #tpu.core_type<tc>, window_params = [{transform_indices = @transform_0, window_bounds = array<i64: 8, 128>}, {pipeline_mode = #tpu.pipeline_mode<synchronous>, transform_indices = @transform_1, window_bounds = array<i64: 128, 32>}, {transform_indices = @transform_2, window_bounds = array<i64: 8, 1>}, {pipeline_mode = #tpu.pipeline_mode<synchronous>, transform_indices = @transform_3, window_bounds = array<i64: 1, 32>}, {transform_indices = @transform_4, window_bounds = array<i64: 1, 1, 8>}, {transform_indices = @transform_5, window_bounds = array<i64: 1, 1, 8>}]} {
    %c0 = arith.constant 0 : index
    %c0_0 = arith.constant 0 : index
    %0 = vector.load %arg1[%c0, %c0_0] : memref<8x128xf32, #tpu.memory_space<vmem>>, vector<8x128xf32>
    %cst = arith.constant 2.000000e+00 : f32
    %1 = vector.broadcast %cst : f32 to vector<8x128xf32>
    %2 = arith.mulf %0, %1 : vector<8x128xf32>
    %3 = arith.truncf %2 : vector<8x128xf32> to vector<8x128xbf16>
    %c0_1 = arith.constant 0 : index
    %c0_2 = arith.constant 0 : index
    %4 = vector.load %arg2[%c0_1, %c0_2] : memref<128x32xbf16, #tpu.memory_space<vmem>>, vector<128x32xbf16>
    %cst_3 = arith.constant dense<0.000000e+00> : vector<8x32xf32>
    %5 = tpu.matmul %3, %4, %cst_3 {dimension_numbers = #tpu.dot_dimension_numbers<[1], [0], [0], [1], [0, 0, 1, 1], [], []>} : vector<8x128xbf16>, vector<128x32xbf16>, vector<8x32xf32> -> vector<8x32xf32>
    %c0_4 = arith.constant 0 : index
    %c0_5 = arith.constant 0 : index
    %6 = vector.load %arg3[%c0_4, %c0_5] : memref<8x1xi32, #tpu.memory_space<vmem>>, vector<8x1xi32>
    %c0_6 = arith.constant 0 : index
    %c0_7 = arith.constant 0 : index
    %7 = vector.load %arg4[%c0_6, %c0_7] : memref<1x32xi32, #tpu.memory_space<vmem>>, vector<1x32xi32>
    %8 = vector.broadcast %6 : vector<8x1xi32> to vector<8x32xi32>
    %9 = vector.broadcast %7 : vector<1x32xi32> to vector<8x32xi32>
    %10 = arith.cmpi eq, %8, %9 : vector<8x32xi32>
    %cst_8 = arith.constant dense<0xFF800000> : vector<8xf32>
    %11 = vector.multi_reduction <maximumf>, %5, %cst_8 [1] : vector<8x32xf32> to vector<8xf32>
    %12 = vector.shape_cast %11 : vector<8xf32> to vector<8x1xf32>
    %13 = vector.broadcast %12 : vector<8x1xf32> to vector<8x32xf32>
    %14 = arith.subf %5, %13 : vector<8x32xf32>
    %15 = math.exp %14 : vector<8x32xf32>
    %cst_9 = arith.constant 0.000000e+00 : f32
    %16 = vector.broadcast %cst_9 : f32 to vector<8x1xf32>
    %17 = arith.subf %16, %12 : vector<8x1xf32>
    %18 = math.exp %17 : vector<8x1xf32>
    %19 = arith.truncf %0 : vector<8x128xf32> to vector<8x128xbf16>
    %20 = arith.extf %19 : vector<8x128xbf16> to vector<8x128xf32>
    %21 = arith.extf %3 : vector<8x128xbf16> to vector<8x128xf32>
    %22 = arith.mulf %21, %20 : vector<8x128xf32>
    %cst_10 = arith.constant dense<0.000000e+00> : vector<8xf32>
    %23 = vector.multi_reduction <add>, %22, %cst_10 [1] : vector<8x128xf32> to vector<8xf32>
    %24 = vector.shape_cast %23 : vector<8xf32> to vector<8x1xf32>
    %25 = arith.subf %24, %12 : vector<8x1xf32>
    %26 = math.exp %25 : vector<8x1xf32>
    %27 = vector.shape_cast %18 : vector<8x1xf32> to vector<8x1xf32>
    %28 = vector.broadcast %27 : vector<8x1xf32> to vector<8x32xf32>
    %29 = arith.select %10, %15, %28 : vector<8x32xi1>, vector<8x32xf32>
    %cst_11 = arith.constant dense<0.000000e+00> : vector<8xf32>
    %30 = vector.multi_reduction <add>, %29, %cst_11 [1] : vector<8x32xf32> to vector<8xf32>
    %31 = vector.shape_cast %30 : vector<8xf32> to vector<8x1xf32>
    %32 = arith.subf %31, %26 : vector<8x1xf32>
    %33 = arith.addf %32, %18 : vector<8x1xf32>
    %34 = vector.shape_cast %18 : vector<8x1xf32> to vector<8x1xf32>
    %35 = vector.broadcast %34 : vector<8x1xf32> to vector<8x32xf32>
    %36 = arith.select %10, %35, %15 : vector<8x32xi1>, vector<8x32xf32>
    %cst_12 = arith.constant dense<0.000000e+00> : vector<8xf32>
    %37 = vector.multi_reduction <add>, %36, %cst_12 [1] : vector<8x32xf32> to vector<8xf32>
    %38 = vector.shape_cast %37 : vector<8xf32> to vector<8x1xf32>
    %39 = arith.divf %33, %38 : vector<8x1xf32>
    %40 = math.log %39 : vector<8x1xf32>
    %41 = vector.shape_cast %40 : vector<8x1xf32> to vector<1x8xf32>
    %c0_13 = arith.constant 0 : index
    %c0_14 = arith.constant 0 : index
    %c0_15 = arith.constant 0 : index
    %42 = vector.load %arg5[%c0_13, %c0_14, %c0_15] : memref<1x1x8xf32, #tpu.memory_space<vmem>>, vector<1x1x8xf32>
    %43 = vector.shape_cast %42 : vector<1x1x8xf32> to vector<1x8xf32>
    %44 = arith.divf %41, %43 : vector<1x8xf32>
    %c0_16 = arith.constant 0 : index
    %c0_17 = arith.constant 0 : index
    %c0_18 = arith.constant 0 : index
    %45 = vector.load %arg6[%c0_16, %c0_17, %c0_18] : memref<1x1x8xf32, #tpu.memory_space<vmem>>, vector<1x1x8xf32>
    %46 = vector.shape_cast %45 : vector<1x1x8xf32> to vector<1x8xf32>
    %47 = vector.shape_cast %44 : vector<1x8xf32> to vector<1x1x8xf32>
    tpu.vector_store %arg6[%c0_16, %c0_17, %c0_18], %47 {strides = array<i32>} : memref<1x1x8xf32, #tpu.memory_space<vmem>>, vector<1x1x8xf32>,
    return
  }
  func.func @transform_0(%arg0: i32) -> (i32, i32) {
    %c0_i32 = arith.constant 0 : i32
    %c0_i32_0 = arith.constant 0 : i32
    return %arg0, %c0_i32 : i32, i32
  }
  func.func @transform_1(%arg0: i32) -> (i32, i32) {
    %c0_i32 = arith.constant 0 : i32
    %c0_i32_0 = arith.constant 0 : i32
    %c0_i32_1 = arith.constant 0 : i32
    return %c0_i32, %c0_i32_0 : i32, i32
  }
  func.func @transform_2(%arg0: i32) -> (i32, i32) {
    %c0_i32 = arith.constant 0 : i32
    %c0_i32_0 = arith.constant 0 : i32
    return %arg0, %c0_i32 : i32, i32
  }
  func.func @transform_3(%arg0: i32) -> (i32, i32) {
    %c0_i32 = arith.constant 0 : i32
    %c0_i32_0 = arith.constant 0 : i32
    %c0_i32_1 = arith.constant 0 : i32
    return %c0_i32, %c0_i32_0 : i32, i32
  }
  func.func @transform_4(%arg0: i32) -> (i32, i32, i32) {
    %c0_i32 = arith.constant 0 : i32
    %c0_i32_0 = arith.constant 0 : i32
    %c0_i32_1 = arith.constant 0 : i32
    return %arg0, %c0_i32, %c0_i32_0 : i32, i32, i32
  }
  func.func @transform_5(%arg0: i32) -> (i32, i32, i32) {
    %c0_i32 = arith.constant 0 : i32
    %c0_i32_0 = arith.constant 0 : i32
    %c0_i32_1 = arith.constant 0 : i32
    return %arg0, %c0_i32, %c0_i32_0 : i32, i32, i32
  }
}

</mosaic_0001>

<bundles_post_ra>
// kernel: tpu_custom_call.1
= control target key start
LH: loop header
LB: loop body
LE: loop exit
PB: predicated region body
PF: predicated region fallthrough
CT: control target
= control target key end

     0   :  { %10 = vsyncpa [#allocation3], 0  ;;  %s869_s0 = inlined_call_operand.vmem [shape: f32[32,128], index: 0, kind: input, shape index: {}]   ;;  %s870_s1 = inlined_call_operand.vmem [shape: bf16[128,32], index: 1, kind: input, shape index: {}]   ;;  %s871_s2 = inlined_call_operand.vmem [shape: s32[32,1], index: 2, kind: input, shape index: {}]   ;;  %s872_s3 = inlined_call_operand.vmem [shape: s32[1,32], index: 3, kind: input, shape index: {}]   ;;  %s873_s4 = inlined_call_operand.vmem [shape: f32[4,1,8], index: 4, kind: input, shape index: {}]   ;;  %s874_s5 = inlined_call_operand.hbm [shape: f32[4,1,8], index: 5, kind: output, shape index: {}]  }
   0x1   :  { %12 = vsyncpa [#allocation3 + $0x1], 0  ;;  %s725_s18 = smov 0   ;;  %s727_s19 = smov 0  }
   0x2   :  { %s729_s20 = smov 0   ;;  %s731_s21 = smov 0  }
   0x3 LB: > { %s746_s22 = sadd.s32 4294967295, %s689_s21   ;;  %s515_s23 = sadd.s32 4294967294, %s689_s21   ;;  %s689_s21 = sphi %s731_s21, %s880_s21   ;;  %s685_s20 = sphi %s729_s20, %s879_s20   ;;  %s681_s19 = sphi %s727_s19, %s878_s19   ;;  %s677_s18 = sphi %s725_s18, %s877_s18  }
   0x4   : > { %s750_s24 = sadd.s32 1, %s689_s21   ;;  %s145_s25 = sadd.s32 1, %s685_s20 }
   0x5   : > { %s142_s26 = ssub.s32 %s689_s21, %s750_s24  ;;  %p155_p0 = scmp.ne.s32.totalorder %s685_s20, %s681_s19 }
   0x6   : > { %p143_p1 = scmp.eq.s32.totalorder %s142_s26, 0  ;;  %p156_p2 = scmp.eq.s32.totalorder %s746_s22, 3 }
   0x7   : > { %p161_p3 = scmp.ne.s32.totalorder %s681_s19, %s677_s18  ;;  %p162_p4 = scmp.eq.s32.totalorder %s515_s23, 3 }
   0x8   : > { %s761_s27 = scalar_select %p143_p1, %s685_s20, %s145_s25  }
   0x9   : > { %p763_p5 = por %p156_p2, %p155_p0  ;;  %p767_p6 = por %p162_p4, %p161_p3 }
   0xa   : > { %p518_p7 = scmp.ge.s32.totalorder %s689_s21, 1  ;;  %p206_p8 = scmp.lt.s32.totalorder %s689_s21, 5 }
   0xc   : > { %p207_p9 = pnand %p518_p7, %p206_p8 }
   0xd   : > { %v607_v0 = vld [vmem:[%s870_s1] sm:$0xff] (!%p207_p9)   ;;  %v691_v1 = vmov (!%p207_p9), 0.0   ;;  %v608_v2 = vld [vmem:[%s870_s1 + $0x8] sm:$0xff] (!%p207_p9)   ;;  %vm692_vm0 = vmmov (!%p207_p9), 0   ;;  %v609_v3 = vld [vmem:[%s870_s1 + $0x10] sm:$0xff] (!%p207_p9)   ;;  %p239_p10 = scmp.lt.s32.totalorder (!%p207_p9), %s746_s22, 3  ;;  %v417_v52 = vlaneseq (!%p207_p9) }
   0xe   : > { %210 = sbr.rel (%p207_p9) target bundleno = 733 (0x2dd), region = 40  ;;  %543 = vmatprep.subr.bf16.mxu0 (!%p207_p9), %v691_v1  ;;  %559 = vmatprep.mubr.msk.bf16.mxu0 (!%p207_p9), %vm692_vm0, %v691_v1  ;;  %v610_v4 = vld [vmem:[%s870_s1 + $0x18] sm:$0xff] (!%p207_p9)   ;;  %v611_v5 = vld [vmem:[%s870_s1 + $0x20] sm:$0xff] (!%p207_p9)   ;;  %v612_v6 = vld [vmem:[%s870_s1 + $0x28] sm:$0xff] (!%p207_p9)   ;;  %v693_v16 = vmov (!%p207_p9), 0   ;;  %vm368_vm1 = vcmask (!%p207_p9), 261120  }
   0xf   : > { %544 = vmatpush3.bf16.msra.mxu0 (!%p207_p9), %v607_v0  ;;  %v613_v7 = vld [vmem:[%s870_s1 + $0x30] sm:$0xff] (!%p207_p9)   ;;  %v614_v10 = vld [vmem:[%s870_s1 + $0x38] sm:$0xff] (!%p207_p9)   ;;  %605 = vset.pattern.permute.xlu0 (!%p207_p9), %v693_v16  ;;  %v529_v28 = vld [vmem:[%s872_s3] ss:$0 sm:$0xff] (!%p207_p9)  ;;  %v418_v53 = vand.u32 (!%p207_p9), 127, %v417_v52  ;;  %v420_v54 = vshrl.u32 (!%p207_p9), %v417_v52, 7 }
  0x10   : > { %545 = vmatprep.subr.bf16.mxu0 (!%p207_p9), %v691_v1  ;;  %606 = vset.pattern.permute.xlu1 (!%p207_p9), %v693_v16  ;;  %s531_s25 = sshll.u32 (!%p207_p9), %s746_s22, 4  ;;  %vm424_vm3 = vcmask (!%p207_p9), 57344  }
  0x11   : > { %v421_v55 = vsub.s32 (!%p207_p9), %v418_v53, %v420_v54  ;;  %s827_s8 = scalar_lea.hbm (!%p207_p9), %s874_s5, %s531_s25 }
  0x13   : > { %546 = vmatpush3.bf16.msra.mxu0 (!%p207_p9), %v608_v2 }
  0x14   : > { %547 = vmatprep.subr.bf16.mxu0 (!%p207_p9), %v691_v1 }
  0x15   : > { %s787_s13 = scalar_select %p239_p10, %s746_s22, 3 }
  0x16   : > { %s694_s22 = smov [#allocation2]  }
  0x17   : > { %548 = vmatpush3.bf16.msra.mxu0 %v609_v3  ;;  %s519_s16 = sshll.u32 %s787_s13, 3  ;;  %s249_s23 = scalar_lea.vmem %s873_s4, %s787_s13 }
  0x18   : > { %549 = vmatprep.subr.bf16.mxu0 %v691_v1  ;;  %s242_s30 = scalar_lea.vmem %s869_s0, %s519_s16  ;;  %s246_s12 = scalar_lea.vmem %s871_s2, %s519_s16  ;;  %v530_v36 = vld [vmem:[%s249_s23] ss:$0 sm:$0xff] }
  0x19   : > { %v251_v8 = vld [vmem:[%s242_s30] sm:$0xff]  ;;  %s237_s13 = sand.u32 1, %s681_s19   ;;  %s631_s11 = sshll.u32 %s694_s22, 4  ;;  %s632_s11 = int_to_ptr.vmem [resolvable:$false] %s631_s11 }
  0x1a   : > { %v252_v9 = vmul.f32 2.0, %v251_v8  ;;  %v378_v12 = vpack.c.bf16 %v251_v8, %v251_v8  ;;  %v358_v22 = vld [vmem:[%s246_s12] sm:$0xff]  ;;  %s238_s26 = scalar_lea.vmem [#allocation2], %s237_s13  ;;  %s427_s9 = scalar_lea.sflag [#allocation3], %s237_s13 }
  0x1b   : > { %550 = vmatpush3.bf16.msra.mxu0 %v610_v4  ;;  %s439_s30 = sshll.u32 %s238_s26, 4  ;;  %s633_s12 = scalar_lea.vmem %s632_s11, 32  ;;  %s829_s30 = int_to_ptr.vmem [resolvable:$true] %s439_s30 }
  0x1c   : > { %551 = vmatprep.subr.bf16.mxu0 %v691_v1  ;;  %v253_v11 = vpack.c.bf16 %v252_v9, %v252_v9  ;;  %v379_v13 = vunpack.c.l.bf16 %v378_v12  ;;  %s627_s10 = scalar_lea.vmem %s829_s30, 16  ;;  %p634_p0 = scmp.lt.s32.totalorder %s829_s30, %s632_s11 }
  0x1d   : > { %p628_p11 = scmp.ne.s32.totalorder %s829_s30, %s627_s10  ;;  %p635_p1 = scmp.lt.s32.totalorder %s633_s12, %s627_s10 }
  0x1e   : > { %v380_v14 = vunpack.c.l.bf16 %v253_v11 }
  0x1f   : > { %552 = vmatpush3.bf16.msra.mxu0 %v611_v5  ;;  %p629_p12 = pnand %p628_p11, %p763_p5  ;;  %p636_p2 = por %p635_p1, %p634_p0 }
  0x20   : > { %553 = vmatprep.subr.bf16.mxu0 %v691_v1  ;;  %v381_v15 = vmul.f32 %v380_v14, %v379_v13 }
  0x21   : > { %p630_p13 = pneg %p629_p12 }
  0x22   : > { %382 = vadd.xlane.f32.xlu1 %v381_v15 }
  0x23   : > { %554 = vmatpush3.bf16.msra.mxu0 %v612_v6  ;;  %p637_p3 = pnand %p636_p2, %p630_p13 }
  0x24   : > { %555 = vmatprep.subr.bf16.mxu0 %v691_v1 }
  0x27   : > { %556 = vmatpush3.bf16.msra.mxu0 %v613_v7 }
  0x28   : > { %557 = vmatprep.subr.bf16.mxu0 %v691_v1 }
  0x2b   : > { %558 = vmatpush3.bf16.msra.mxu0 %v614_v10 }
  0x2e   : > { %560 = vmatmul.mubr.bf16.vlgmr.msra.gmra.mrb[0].mxu0 %v253_v11 }
  0xaf   : > { %v383_v37 = vpop.xlane.xlu1 %382 }
 0x101   : > { %v352_v17 = vpop.f32.mrb[0].mxu0 }
 0x102   : > { %v561_v18 = vpop.f32.mrb[1].mxu0  ;;  %v369_v19 = vsel %vm368_vm1, %v352_v17, -inf }
 0x103   : > { %370 = vmax.xlane.f32.xlu0 %v369_v19  ;;  %v355_v20 = vpop.f32.mrb[2].mxu0 }
 0x104   : > { %v562_v21 = vpop.f32.mrb[3].mxu0 }
 0x119   : > { %361 = vperm.xlu0 %605, %v358_v22  }
 0x190   : > { %v371_v23 = vpop.xlane.xlu0 %370 }
 0x191   : > { %v372_v24 = vsub.f32 %v352_v17, %v371_v23  ;;  %v375_v25 = vsub.f32 0.0, %v371_v23  ;;  %v384_v38 = vsub.f32 %v383_v37, %v371_v23 }
 0x193   : > { %v373_v26 = vmul.f32 1.442695, %v372_v24  ;;  %v376_v27 = vmul.f32 1.442695, %v375_v25  ;;  %v385_v39 = vmul.f32 1.442695, %v384_v38 }
 0x195   : > { %615 = vpow2.f32 %v373_v26 }
 0x196   : > { %617 = vpow2.f32 %v376_v27 }
 0x197   : > { %619 = vpow2.f32 %v385_v39 }
 0x198   : > { %v362_v29 = vpop.permute.xlu0 %361 }
 0x199   : > { %vm367_vm2 = vcmp.eq.s32.totalorder %v362_v29, %v529_v28 }
 0x19f   : > { %v616_v30 = vpop.eup %615 }
 0x1a0   : > { %v618_v31 = vpop.eup %617 }
 0x1a1   : > { %v393_v32 = vsel %vm367_vm2, %v618_v31, %v616_v30  ;;  %v387_v34 = vsel %vm367_vm2, %v616_v30, %v618_v31  ;;  %v620_v42 = vpop.eup %619 }
 0x1a2   : > { %v394_v33 = vsel %vm368_vm1, %v393_v32, 0.0  ;;  %v388_v35 = vsel %vm368_vm1, %v387_v34, 0.0 }
 0x1a3   : > { %395 = vadd.xlane.f32.xlu1 %v394_v33 }
 0x1a7   : > { %389 = vadd.xlane.f32.xlu1 %v388_v35 }
 0x1b8   : > { %408 = vbcast.lane.b32.xlu1 %v530_v36, 256 }
 0x230   : > { %v396_v40 = vpop.xlane.xlu1 %395 }
 0x231   : > { %621 = vrcp.f32 %v396_v40 }
 0x234   : > { %v390_v41 = vpop.xlane.xlu1 %389 }
 0x235   : > { %v391_v43 = vsub.f32 %v390_v41, %v620_v42 }
 0x237   : > { %v392_v44 = vadd.f32 %v618_v31, %v391_v43 }
 0x238   : > { %v409_v45 = vpop.permute.xlu1 %408 }
 0x239   : > { %623 = vrcp.f32 %v409_v45 }
 0x23b   : > { %v622_v46 = vpop.eup %621 }
 0x23c   : > { %v398_v47 = vmul.f32 %v622_v46, %v392_v44 }
 0x23e   : > { %625 = vlog2.f32 %v398_v47 }
 0x243   : > { %v624_v48 = vpop.eup %623 }
 0x248   : > { %v626_v49 = vpop.eup %625 }
 0x249   : > { %v400_v50 = vmul.f32 0.6931472, %v626_v49 }
 0x24b   : > { %v412_v51 = vmul.f32 %v624_v48, %v400_v50 }
 0x24d   : > { %415 = vperm.xlu1 %606, %v412_v51  }
 0x2cc   : > { %v416_v56 = vpop.permute.xlu1 %415 }
 0x2cd   : > { %v422_v57 = vrot.slane %v416_v56, %v421_v55 }
 0x2cf   : > { %425 = vst.msk [vmem:[%s238_s26] sm:$0x1] %vm424_vm3, %v422_v57 }
 0x2d0   : > { %640 = shalt.err (!%p637_p3)
}
 0x2d1   : > { %s641_s14 = scalar_lea.hbm %s827_s8, 16  ;;  %s645_s17 = scalar_lea.hbm %s874_s5, 64 }
 0x2d2   : > { %p642_p4 = scmp.ne.s32.totalorder %s827_s8, %s641_s14  ;;  %p646_p9 = scmp.lt.u32.totalorder %s827_s8, %s874_s5 }
 0x2d3   : > { %p647_p10 = scmp.lt.u32.totalorder %s645_s17, %s641_s14  ;;  %p649_p12 = scmp.lt.u32.totalorder %s641_s14, %s827_s8 }
 0x2d4   : > { %p643_p7 = pnand %p642_p4, %p763_p5 }
 0x2d5   : > { %p648_p11 = por %p647_p10, %p646_p9 }
 0x2d6   : > { %p644_p8 = pneg %p643_p7 }
 0x2d7   : > { %p650_p13 = por %p649_p12, %p648_p11 }
 0x2d9   : > { %p651_p0 = pnand %p650_p13, %p644_p8 }
 0x2db   : > { %654 = shalt.err (!%p651_p0)
}
 0x2dc   : > { %563 = dma.vmem_to_hbm [thread:$0]  (%p763_p5), %s829_s30, 16, %s827_s8, %s427_s9  }
 0x2dd PF: > { %p569_p1 = scmp.ge.s32.totalorder %s689_s21, 2  ;;  %s451_s25 = sand.u32 1, %s677_s18  }
 0x2de   : > { %s452_s26 = scalar_lea.sflag [#allocation3], %s451_s25 }
 0x2df   : > { %p566_p2 = pnand %p569_p1, %p767_p6 }
 0x2e1   : > { %672 = dma.done.wait (!%p566_p2), %s452_s26, 16  }
 0x2e2   : > { %674 = vsyncadd (!%p566_p2), %s452_s26, 4294967280  ;;  %p15_p3 = scmp.ge.s32.totalorder %s750_s24, 6   ;;  %s877_s18 = smov %s681_s19 }
 0x2e3   : > { %s878_s19 = smov %s685_s20  ;;  %s879_s20 = smov %s761_s27 }
 0x2e4   : > { %s880_s21 = smov %s750_s24  ;;  %17 = sbr.rel (!%p15_p3) target bundleno = 3 (0x3), region = 81 }
 0x2eb   :  { %456 = vsyncpa [#allocation3], 1 }
 0x2ec   :  { %458 = vsyncpa [#allocation3 + $0x1], 1 }

</bundles_post_ra>
